<compile_context>
chip_gen: v5e
topology: v5e:2x2
jax: 0.10.0
libtpu: 0.0.40
codegen_flags: <defaults>
</compile_context>

<pallas_src>
import functools
import math

import numpy as np

import jax
import jax.numpy as jnp
from jax.experimental import pallas as pl
from jax.experimental.pallas import tpu as pltpu


# ---------------------------------------------------------------------------
# Fused forward kernel (one batch element per grid step)
# ---------------------------------------------------------------------------

def _cnn_kernel(x_ref, t1_ref, b1r_ref, r1_ref, c1_ref,
                t2_ref, b2r_ref, r2_ref, c2_ref,
                w1a_ref, fb1_ref, w2t_ref, fb2_ref, w3t_ref, fb3_ref,
                o_ref):
    # Static sizes derived from the (static) ref shapes.
    H = x_ref.shape[1]
    K1 = t1_ref.shape[0]                 # conv1 kernel size
    S1 = H - K1 + 1                      # conv1 output spatial size
    P1 = r1_ref.shape[0]                 # pool1 output spatial size (S1 // 2)
    IC2 = c1_ref.shape[1] // P1          # conv2 input channels (= conv1out)
    K2 = t2_ref.shape[0] // IC2          # conv2 kernel size
    S2 = P1 - K2 + 1                     # conv2 output spatial size
    P2 = r2_ref.shape[0]                 # pool2 output spatial size

    x = x_ref[0]                                                   # (H, H) f32

    # ---- conv1 + bias + ReLU: banded MXU matmuls, lane-dense (S1, OC1*S1) ---
    acc1 = jnp.dot(x[0:S1, :], t1_ref[0], preferred_element_type=jnp.float32)
    for di in range(1, K1):
        acc1 = acc1 + jnp.dot(x[di:di + S1, :], t1_ref[di],
                              preferred_element_type=jnp.float32)
    y1 = jnp.maximum(acc1 + b1r_ref[...], 0.0)                     # (S1, OC1*S1)

    # ---- fused MaxPool2d(2): window max + 0/1 selection matmuls -------------
    m1 = jnp.maximum(jnp.maximum(y1[:-1, :-1], y1[:-1, 1:]),
                     jnp.maximum(y1[1:, :-1], y1[1:, 1:]))
    p1 = jnp.dot(r1_ref[...],
                 jnp.dot(m1, c1_ref[...], preferred_element_type=jnp.float32),
                 preferred_element_type=jnp.float32)               # (P1, IC2*P1)

    # ---- conv2 + bias + ReLU ------------------------------------------------
    acc2 = None
    for ic in range(IC2):
        for di in range(K2):
            a = p1[di:di + S2, ic * P1:(ic + 1) * P1]              # (S2, P1)
            contrib = jnp.dot(a, t2_ref[ic * K2 + di],
                              preferred_element_type=jnp.float32)  # (S2, OC2*S2)
            acc2 = contrib if acc2 is None else acc2 + contrib
    y2 = jnp.maximum(acc2 + b2r_ref[...], 0.0)                     # (S2, OC2*S2)

    # ---- fused MaxPool2d(2) -------------------------------------------------
    m2 = jnp.maximum(jnp.maximum(y2[:-1, :-1], y2[:-1, 1:]),
                     jnp.maximum(y2[1:, :-1], y2[1:, 1:]))
    p2 = jnp.dot(r2_ref[...],
                 jnp.dot(m2, c2_ref[...], preferred_element_type=jnp.float32),
                 preferred_element_type=jnp.float32)               # (P2, OC2*P2)

    # ---- fc1 (NCHW flatten folded into the pre-permuted weight blocks) ------
    h = fb1_ref[...]                                               # (1, F1)
    for a_row in range(P2):
        h = h + jnp.dot(p2[a_row:a_row + 1, :], w1a_ref[a_row],
                        preferred_element_type=jnp.float32)
    h = jnp.maximum(h, 0.0)

    # ---- fc2 + ReLU ----------------------------------------------------------
    h = jnp.maximum(jnp.dot(h, w2t_ref[...],
                            preferred_element_type=jnp.float32) + fb2_ref[...],
                    0.0)                                           # (1, F2)

    # ---- fc3 + log_softmax ---------------------------------------------------
    logits = jnp.dot(h, w3t_ref[...],
                     preferred_element_type=jnp.float32) + fb3_ref[...]
    mx = jnp.max(logits, axis=-1, keepdims=True)
    s = logits - mx
    out = s - jnp.log(jnp.sum(jnp.exp(s), axis=-1, keepdims=True))
    o_ref[0] = out.astype(o_ref.dtype)


_PACK_ORDER = ("t1", "b1r", "r1", "c1", "t2", "b2r", "r2", "c2",
               "w1a", "fb1", "w2t", "fb2", "w3t", "fb3")


def cnn_forward(x_nhw, packed):
    """x_nhw: (N, H, W) float32; packed: dict of pre-packed parameters."""
    N, H, W = x_nhw.shape
    n_classes = packed["fb3"].shape[1]
    weights = [packed[k] for k in _PACK_ORDER]

    def const_spec(shape):
        nd = len(shape)
        return pl.BlockSpec(shape, lambda i, nd=nd: (0,) * nd)

    in_specs = [pl.BlockSpec((1, H, W), lambda i: (i, 0, 0))]
    in_specs += [const_spec(w.shape) for w in weights]

    out = pl.pallas_call(
        _cnn_kernel,
        out_shape=jax.ShapeDtypeStruct((N, 1, n_classes), jnp.float32),
        grid=(N,),
        in_specs=in_specs,
        out_specs=pl.BlockSpec((1, 1, n_classes), lambda i: (i, 0, 0)),
        compiler_params=pltpu.CompilerParams(
            dimension_semantics=("parallel",)),
    )(x_nhw, *weights)
    return out.reshape(N, n_classes)


# ---------------------------------------------------------------------------
# Parameter pre-packing (done once at init; no per-call glue)
# ---------------------------------------------------------------------------

def _prepack_params(raw, image_size, pool):
    w1 = np.asarray(raw["conv1_w"], np.float32)    # (OC1, 1, K1, K1)
    b1 = np.asarray(raw["conv1_b"], np.float32)
    w2 = np.asarray(raw["conv2_w"], np.float32)    # (OC2, OC1, K2, K2)
    b2 = np.asarray(raw["conv2_b"], np.float32)
    fw1 = np.asarray(raw["fc1_w"], np.float32)     # (F1, OC2*P2*P2)
    fb1 = np.asarray(raw["fc1_b"], np.float32)
    fw2 = np.asarray(raw["fc2_w"], np.float32)     # (F2, F1)
    fb2 = np.asarray(raw["fc2_b"], np.float32)
    fw3 = np.asarray(raw["fc3_w"], np.float32)     # (10, F2)
    fb3 = np.asarray(raw["fc3_b"], np.float32)

    OC1, _, K1, _ = w1.shape
    S1 = image_size - K1 + 1
    P1 = S1 // pool
    OC2, IC2, K2, _ = w2.shape
    S2 = P1 - K2 + 1
    P2 = S2 // pool
    F1 = fw1.shape[0]
    assert S1 >= 2 and S2 >= 2 and P1 >= 1 and P2 >= 1

    # conv1 banded weights: t1[di, oj+dj, oc*S1+oj] = w1[oc, 0, di, dj]
    t1 = np.zeros((K1, image_size, OC1 * S1), np.float32)
    for oc in range(OC1):
        for di in range(K1):
            for dj in range(K1):
                for oj in range(S1):
                    t1[di, oj + dj, oc * S1 + oj] = w1[oc, 0, di, dj]
    b1r = np.repeat(b1, S1)[None, :]                       # (1, OC1*S1)

    # pool1 stride-2 selection matrices
    r1 = np.zeros((P1, S1 - 1), np.float32)
    r1[np.arange(P1), 2 * np.arange(P1)] = 1.0
    c1 = np.zeros((OC1 * S1 - 1, OC1 * P1), np.float32)
    for oc in range(OC1):
        for b in range(P1):
            c1[oc * S1 + 2 * b, oc * P1 + b] = 1.0

    # conv2 banded weights: t2[ic*K2+di, oj+dj, oc*S2+oj] = w2[oc, ic, di, dj]
    t2 = np.zeros((IC2 * K2, P1, OC2 * S2), np.float32)
    for oc in range(OC2):
        for ic in range(IC2):
            for di in range(K2):
                for dj in range(K2):
                    for oj in range(S2):
                        t2[ic * K2 + di, oj + dj, oc * S2 + oj] = w2[oc, ic, di, dj]
    b2r = np.repeat(b2, S2)[None, :]                       # (1, OC2*S2)

    # pool2 stride-2 selection matrices
    r2 = np.zeros((P2, S2 - 1), np.float32)
    r2[np.arange(P2), 2 * np.arange(P2)] = 1.0
    c2 = np.zeros((OC2 * S2 - 1, OC2 * P2), np.float32)
    for oc in range(OC2):
        for b in range(P2):
            c2[oc * S2 + 2 * b, oc * P2 + b] = 1.0

    # fc1 with the NCHW flatten folded in:
    #   w1a[a, oc*P2 + b, f] = fc1_w[f, oc*P2*P2 + a*P2 + b]
    w1a = np.zeros((P2, OC2 * P2, F1), np.float32)
    for oc in range(OC2):
        for a in range(P2):
            for b in range(P2):
                w1a[a, oc * P2 + b, :] = fw1[:, oc * P2 * P2 + a * P2 + b]

    packed = dict(
        t1=t1, b1r=b1r, r1=r1, c1=c1,
        t2=t2, b2r=b2r, r2=r2, c2=c2,
        w1a=w1a, fb1=fb1[None, :],
        w2t=np.ascontiguousarray(fw2.T), fb2=fb2[None, :],
        w3t=np.ascontiguousarray(fw3.T), fb3=fb3[None, :])
    return {k: jnp.asarray(v) for k, v in packed.items()}


# ---------------------------------------------------------------------------
# Model wrapper
# ---------------------------------------------------------------------------

def _as_int(k):
    return int(k[0]) if isinstance(k, (tuple, list)) else int(k)


def _uniform(key, shape, fan_in):
    bound = 1.0 / math.sqrt(fan_in)
    return jax.random.uniform(key, shape, jnp.float32, -bound, bound)


class CNNnetPallas:
    """Pallas re-implementation of CNNnet.forward (stride=1, padding=0, 2x2 pool)."""

    def __init__(self, config, key):
        self.image_size = config["image_size"] if config["image_size"] else 28
        c1out = config["conv1out"] if config["conv1out"] else 6
        k1 = _as_int(config["conv1kernel"] if config["conv1kernel"] else 3)
        s1 = config["conv1stride"] if config["conv1stride"] else 1
        p1 = config.get("conv1pad", 0) or 0
        c2out = config["conv2out"] if config["conv2out"] else 16
        k2 = _as_int(config["conv2kernel"] if config["conv2kernel"] else 3)
        s2 = config["conv2stride"] if config["conv2stride"] else 1
        p2 = config.get("conv2pad", 0) or 0
        mp = config["maxpoolkernel"] if config["maxpoolkernel"] else 2
        f1 = config["fc1out"] if config["fc1out"] else 120
        f2 = config["fc2out"] if config["fc2out"] else 84

        # TODO(synk): only stride=1 / padding=0 convs and 2x2 max pooling are
        # lowered to the fused Pallas kernel (the module's configured values).
        assert s1 == 1 and s2 == 1 and p1 == 0 and p2 == 0 and mp == 2

        out_c1 = self.image_size - k1 + 1
        out_p1 = out_c1 // mp
        out_c2 = out_p1 - k2 + 1
        out_p2 = out_c2 // mp
        flat = c2out * out_p2 * out_p2

        ks = jax.random.split(key, 10)
        # Raw parameters kept in PyTorch layouts (for the reference check).
        self.conv1_w = _uniform(ks[0], (c1out, 1, k1, k1), 1 * k1 * k1)
        self.conv1_b = _uniform(ks[1], (c1out,), 1 * k1 * k1)
        self.conv2_w = _uniform(ks[2], (c2out, c1out, k2, k2), c1out * k2 * k2)
        self.conv2_b = _uniform(ks[3], (c2out,), c1out * k2 * k2)
        self.fc1_w = _uniform(ks[4], (f1, flat), flat)      # PyTorch Linear: (out, in)
        self.fc1_b = _uniform(ks[5], (f1,), flat)
        self.fc2_w = _uniform(ks[6], (f2, f1), f1)
        self.fc2_b = _uniform(ks[7], (f2,), f1)
        self.fc3_w = _uniform(ks[8], (10, f2), f2)
        self.fc3_b = _uniform(ks[9], (10,), f2)

        raw = dict(conv1_w=self.conv1_w, conv1_b=self.conv1_b,
                   conv2_w=self.conv2_w, conv2_b=self.conv2_b,
                   fc1_w=self.fc1_w, fc1_b=self.fc1_b,
                   fc2_w=self.fc2_w, fc2_b=self.fc2_b,
                   fc3_w=self.fc3_w, fc3_b=self.fc3_b)
        self.packed = _prepack_params(raw, self.image_size, mp)
        self._forward = jax.jit(cnn_forward)

    def __call__(self, x):
        n = x.shape[0]
        x_nhw = x.reshape(n, self.image_size, self.image_size).astype(jnp.float32)
        return self._forward(x_nhw, self.packed)


# ---------------------------------------------------------------------------
# Pure-JAX reference (for correctness verification)
# ---------------------------------------------------------------------------

def reference_forward(model, x):
    def conv_relu(x, w, b):
        y = jax.lax.conv_general_dilated(
            x, w, (1, 1), "VALID",
            dimension_numbers=("NCHW", "OIHW", "NCHW"))
        return jax.nn.relu(y + b.reshape(1, -1, 1, 1))

    def pool(x):
        n, c, h, w = x.shape
        x = x[:, :, : 2 * (h // 2), : 2 * (w // 2)]
        return x.reshape(n, c, h // 2, 2, w // 2, 2).max(axis=(3, 5))

    x = pool(conv_relu(x, model.conv1_w, model.conv1_b))
    x = pool(conv_relu(x, model.conv2_w, model.conv2_b))
    x = x.reshape(x.shape[0], -1)
    x = jax.nn.relu(x @ model.fc1_w.T + model.fc1_b)
    x = jax.nn.relu(x @ model.fc2_w.T + model.fc2_b)
    x = x @ model.fc3_w.T + model.fc3_b
    return jax.nn.log_softmax(x, axis=1)


if __name__ == "__main__":
    config = {
        "image_size": 16,
        "conv1out": 4, "conv1kernel": 3, "conv1stride": 1, "conv1pad": 0,
        "conv2out": 8, "conv2kernel": 3, "conv2stride": 1, "conv2pad": 0,
        "maxpoolkernel": 2,
        "fc1out": 32, "fc2out": 16,
    }

    key = jax.random.PRNGKey(0)
    k_param, k_x = jax.random.split(key)
    model = CNNnetPallas(config, k_param)

    x = jax.random.normal(k_x, (2, 1, 16, 16), dtype=jnp.float32)

    out = jax.block_until_ready(model(x))
    ref = jax.block_until_ready(reference_forward(model, x))

    assert out.shape == (2, 10), out.shape
    assert jnp.allclose(out, ref, rtol=1e-4, atol=2e-4), (
        "Pallas output mismatch vs JAX reference: "
        f"max abs err = {float(jnp.max(jnp.abs(out - ref)))}")

    print("KERNEL_OK")
</pallas_src>

<mosaic_0001>
module attributes {stable_mosaic.version = 11 : i64} {
  func.func @_cnn_kernel(%arg0: i32, %arg1: memref<1x16x16xf32, #tpu.memory_space<vmem>>, %arg2: memref<3x16x56xf32, #tpu.memory_space<vmem>>, %arg3: memref<1x56xf32, #tpu.memory_space<vmem>>, %arg4: memref<7x13xf32, #tpu.memory_space<vmem>>, %arg5: memref<55x28xf32, #tpu.memory_space<vmem>>, %arg6: memref<12x7x40xf32, #tpu.memory_space<vmem>>, %arg7: memref<1x40xf32, #tpu.memory_space<vmem>>, %arg8: memref<2x4xf32, #tpu.memory_space<vmem>>, %arg9: memref<39x16xf32, #tpu.memory_space<vmem>>, %arg10: memref<2x16x32xf32, #tpu.memory_space<vmem>>, %arg11: memref<1x32xf32, #tpu.memory_space<vmem>>, %arg12: memref<32x16xf32, #tpu.memory_space<vmem>>, %arg13: memref<1x16xf32, #tpu.memory_space<vmem>>, %arg14: memref<16x10xf32, #tpu.memory_space<vmem>>, %arg15: memref<1x10xf32, #tpu.memory_space<vmem>>, %arg16: memref<1x1x10xf32, #tpu.memory_space<vmem>>) attributes {dimension_semantics = [#tpu.dimension_semantics<parallel>], iteration_bounds = array<i64: 2>, scalar_prefetch = 0 : i64, scratch_operands = 0 : i64, tpu.core_type = #tpu.core_type<tc>, window_params = [{transform_indices = @transform_0, window_bounds = array<i64: 1, 16, 16>}, {pipeline_mode = #tpu.pipeline_mode<synchronous>, transform_indices = @transform_1, window_bounds = array<i64: 3, 16, 56>}, {pipeline_mode = #tpu.pipeline_mode<synchronous>, transform_indices = @transform_2, window_bounds = array<i64: 1, 56>}, {pipeline_mode = #tpu.pipeline_mode<synchronous>, transform_indices = @transform_3, window_bounds = array<i64: 7, 13>}, {pipeline_mode = #tpu.pipeline_mode<synchronous>, transform_indices = @transform_4, window_bounds = array<i64: 55, 28>}, {pipeline_mode = #tpu.pipeline_mode<synchronous>, transform_indices = @transform_5, window_bounds = array<i64: 12, 7, 40>}, {pipeline_mode = #tpu.pipeline_mode<synchronous>, transform_indices = @transform_6, window_bounds = array<i64: 1, 40>}, {pipeline_mode = #tpu.pipeline_mode<synchronous>, transform_indices = @transform_7, window_bounds = array<i64: 2, 4>}, {pipeline_mode = #tpu.pipeline_mode<synchronous>, transform_indices = @transform_8, window_bounds = array<i64: 39, 16>}, {pipeline_mode = #tpu.pipeline_mode<synchronous>, transform_indices = @transform_9, window_bounds = array<i64: 2, 16, 32>}, {pipeline_mode = #tpu.pipeline_mode<synchronous>, transform_indices = @transform_10, window_bounds = array<i64: 1, 32>}, {pipeline_mode = #tpu.pipeline_mode<synchronous>, transform_indices = @transform_11, window_bounds = array<i64: 32, 16>}, {pipeline_mode = #tpu.pipeline_mode<synchronous>, transform_indices = @transform_12, window_bounds = array<i64: 1, 16>}, {pipeline_mode = #tpu.pipeline_mode<synchronous>, transform_indices = @transform_13, window_bounds = array<i64: 16, 10>}, {pipeline_mode = #tpu.pipeline_mode<synchronous>, transform_indices = @transform_14, window_bounds = array<i64: 1, 10>}, {transform_indices = @transform_15, window_bounds = array<i64: 1, 1, 10>}]} {
    %c0 = arith.constant 0 : index
    %c0_0 = arith.constant 0 : index
    %c0_1 = arith.constant 0 : index
    %0 = vector.load %arg1[%c0, %c0_0, %c0_1] : memref<1x16x16xf32, #tpu.memory_space<vmem>>, vector<1x16x16xf32>
    %1 = vector.shape_cast %0 : vector<1x16x16xf32> to vector<16x16xf32>
    %2 = vector.extract_strided_slice %1 {offsets = [0, 0], sizes = [14, 16], strides = [1, 1]} : vector<16x16xf32> to vector<14x16xf32>
    %c0_2 = arith.constant 0 : index
    %c0_3 = arith.constant 0 : index
    %c0_4 = arith.constant 0 : index
    %3 = vector.load %arg2[%c0_2, %c0_3, %c0_4] : memref<3x16x56xf32, #tpu.memory_space<vmem>>, vector<1x16x56xf32>
    %4 = vector.shape_cast %3 : vector<1x16x56xf32> to vector<16x56xf32>
    %cst = arith.constant dense<0.000000e+00> : vector<14x56xf32>
    %5 = tpu.matmul %2, %4, %cst {dimension_numbers = #tpu.dot_dimension_numbers<[1], [0], [0], [1], [0, 0, 1, 1], [], []>} : vector<14x16xf32>, vector<16x56xf32>, vector<14x56xf32> -> vector<14x56xf32>
    %6 = vector.extract_strided_slice %1 {offsets = [1, 0], sizes = [14, 16], strides = [1, 1]} : vector<16x16xf32> to vector<14x16xf32>
    %c1 = arith.constant 1 : index
    %c0_5 = arith.constant 0 : index
    %c0_6 = arith.constant 0 : index
    %7 = vector.load %arg2[%c1, %c0_5, %c0_6] : memref<3x16x56xf32, #tpu.memory_space<vmem>>, vector<1x16x56xf32>
    %8 = vector.shape_cast %7 : vector<1x16x56xf32> to vector<16x56xf32>
    %cst_7 = arith.constant dense<0.000000e+00> : vector<14x56xf32>
    %9 = tpu.matmul %6, %8, %cst_7 {dimension_numbers = #tpu.dot_dimension_numbers<[1], [0], [0], [1], [0, 0, 1, 1], [], []>} : vector<14x16xf32>, vector<16x56xf32>, vector<14x56xf32> -> vector<14x56xf32>
    %10 = arith.addf %5, %9 : vector<14x56xf32>
    %11 = vector.extract_strided_slice %1 {offsets = [2, 0], sizes = [14, 16], strides = [1, 1]} : vector<16x16xf32> to vector<14x16xf32>
    %c2 = arith.constant 2 : index
    %c0_8 = arith.constant 0 : index
    %c0_9 = arith.constant 0 : index
    %12 = vector.load %arg2[%c2, %c0_8, %c0_9] : memref<3x16x56xf32, #tpu.memory_space<vmem>>, vector<1x16x56xf32>
    %13 = vector.shape_cast %12 : vector<1x16x56xf32> to vector<16x56xf32>
    %cst_10 = arith.constant dense<0.000000e+00> : vector<14x56xf32>
    %14 = tpu.matmul %11, %13, %cst_10 {dimension_numbers = #tpu.dot_dimension_numbers<[1], [0], [0], [1], [0, 0, 1, 1], [], []>} : vector<14x16xf32>, vector<16x56xf32>, vector<14x56xf32> -> vector<14x56xf32>
    %15 = arith.addf %10, %14 : vector<14x56xf32>
    %c0_11 = arith.constant 0 : index
    %c0_12 = arith.constant 0 : index
    %16 = vector.load %arg3[%c0_11, %c0_12] : memref<1x56xf32, #tpu.memory_space<vmem>>, vector<1x56xf32>
    %17 = vector.broadcast %16 : vector<1x56xf32> to vector<14x56xf32>
    %18 = arith.addf %15, %17 : vector<14x56xf32>
    %cst_13 = arith.constant 0.000000e+00 : f32
    %19 = vector.broadcast %cst_13 : f32 to vector<14x56xf32>
    %20 = arith.maximumf %18, %19 : vector<14x56xf32>
    %21 = vector.extract_strided_slice %20 {offsets = [0, 0], sizes = [13, 55], strides = [1, 1]} : vector<14x56xf32> to vector<13x55xf32>
    %22 = vector.extract_strided_slice %20 {offsets = [0, 1], sizes = [13, 55], strides = [1, 1]} : vector<14x56xf32> to vector<13x55xf32>
    %23 = arith.maximumf %21, %22 : vector<13x55xf32>
    %24 = vector.extract_strided_slice %20 {offsets = [1, 0], sizes = [13, 55], strides = [1, 1]} : vector<14x56xf32> to vector<13x55xf32>
    %25 = vector.extract_strided_slice %20 {offsets = [1, 1], sizes = [13, 55], strides = [1, 1]} : vector<14x56xf32> to vector<13x55xf32>
    %26 = arith.maximumf %24, %25 : vector<13x55xf32>
    %27 = arith.maximumf %23, %26 : vector<13x55xf32>
    %c0_14 = arith.constant 0 : index
    %c0_15 = arith.constant 0 : index
    %28 = vector.load %arg4[%c0_14, %c0_15] : memref<7x13xf32, #tpu.memory_space<vmem>>, vector<7x13xf32>
    %c0_16 = arith.constant 0 : index
    %c0_17 = arith.constant 0 : index
    %29 = vector.load %arg5[%c0_16, %c0_17] : memref<55x28xf32, #tpu.memory_space<vmem>>, vector<55x28xf32>
    %cst_18 = arith.constant dense<0.000000e+00> : vector<13x28xf32>
    %30 = tpu.matmul %27, %29, %cst_18 {dimension_numbers = #tpu.dot_dimension_numbers<[1], [0], [0], [1], [0, 0, 1, 1], [], []>} : vector<13x55xf32>, vector<55x28xf32>, vector<13x28xf32> -> vector<13x28xf32>
    %cst_19 = arith.constant dense<0.000000e+00> : vector<7x28xf32>
    %31 = tpu.matmul %28, %30, %cst_19 {dimension_numbers = #tpu.dot_dimension_numbers<[1], [0], [0], [1], [0, 0, 1, 1], [], []>} : vector<7x13xf32>, vector<13x28xf32>, vector<7x28xf32> -> vector<7x28xf32>
    %32 = vector.extract_strided_slice %31 {offsets = [0, 0], sizes = [5, 7], strides = [1, 1]} : vector<7x28xf32> to vector<5x7xf32>
    %c0_20 = arith.constant 0 : index
    %c0_21 = arith.constant 0 : index
    %c0_22 = arith.constant 0 : index
    %33 = vector.load %arg6[%c0_20, %c0_21, %c0_22] : memref<12x7x40xf32, #tpu.memory_space<vmem>>, vector<1x7x40xf32>
    %34 = vector.shape_cast %33 : vector<1x7x40xf32> to vector<7x40xf32>
    %cst_23 = arith.constant dense<0.000000e+00> : vector<5x40xf32>
    %35 = tpu.matmul %32, %34, %cst_23 {dimension_numbers = #tpu.dot_dimension_numbers<[1], [0], [0], [1], [0, 0, 1, 1], [], []>} : vector<5x7xf32>, vector<7x40xf32>, vector<5x40xf32> -> vector<5x40xf32>
    %36 = vector.extract_strided_slice %31 {offsets = [1, 0], sizes = [5, 7], strides = [1, 1]} : vector<7x28xf32> to vector<5x7xf32>
    %c1_24 = arith.constant 1 : index
    %c0_25 = arith.constant 0 : index
    %c0_26 = arith.constant 0 : index
    %37 = vector.load %arg6[%c1_24, %c0_25, %c0_26] : memref<12x7x40xf32, #tpu.memory_space<vmem>>, vector<1x7x40xf32>
    %38 = vector.shape_cast %37 : vector<1x7x40xf32> to vector<7x40xf32>
    %cst_27 = arith.constant dense<0.000000e+00> : vector<5x40xf32>
    %39 = tpu.matmul %36, %38, %cst_27 {dimension_numbers = #tpu.dot_dimension_numbers<[1], [0], [0], [1], [0, 0, 1, 1], [], []>} : vector<5x7xf32>, vector<7x40xf32>, vector<5x40xf32> -> vector<5x40xf32>
    %40 = arith.addf %35, %39 : vector<5x40xf32>
    %41 = vector.extract_strided_slice %31 {offsets = [2, 0], sizes = [5, 7], strides = [1, 1]} : vector<7x28xf32> to vector<5x7xf32>
    %c2_28 = arith.constant 2 : index
    %c0_29 = arith.constant 0 : index
    %c0_30 = arith.constant 0 : index
    %42 = vector.load %arg6[%c2_28, %c0_29, %c0_30] : memref<12x7x40xf32, #tpu.memory_space<vmem>>, vector<1x7x40xf32>
    %43 = vector.shape_cast %42 : vector<1x7x40xf32> to vector<7x40xf32>
    %cst_31 = arith.constant dense<0.000000e+00> : vector<5x40xf32>
    %44 = tpu.matmul %41, %43, %cst_31 {dimension_numbers = #tpu.dot_dimension_numbers<[1], [0], [0], [1], [0, 0, 1, 1], [], []>} : vector<5x7xf32>, vector<7x40xf32>, vector<5x40xf32> -> vector<5x40xf32>
    %45 = arith.addf %40, %44 : vector<5x40xf32>
    %46 = vector.extract_strided_slice %31 {offsets = [0, 7], sizes = [5, 7], strides = [1, 1]} : vector<7x28xf32> to vector<5x7xf32>
    %c3 = arith.constant 3 : index
    %c0_32 = arith.constant 0 : index
    %c0_33 = arith.constant 0 : index
    %47 = vector.load %arg6[%c3, %c0_32, %c0_33] : memref<12x7x40xf32, #tpu.memory_space<vmem>>, vector<1x7x40xf32>
    %48 = vector.shape_cast %47 : vector<1x7x40xf32> to vector<7x40xf32>
    %cst_34 = arith.constant dense<0.000000e+00> : vector<5x40xf32>
    %49 = tpu.matmul %46, %48, %cst_34 {dimension_numbers = #tpu.dot_dimension_numbers<[1], [0], [0], [1], [0, 0, 1, 1], [], []>} : vector<5x7xf32>, vector<7x40xf32>, vector<5x40xf32> -> vector<5x40xf32>
    %50 = arith.addf %45, %49 : vector<5x40xf32>
    %51 = vector.extract_strided_slice %31 {offsets = [1, 7], sizes = [5, 7], strides = [1, 1]} : vector<7x28xf32> to vector<5x7xf32>
    %c4 = arith.constant 4 : index
    %c0_35 = arith.constant 0 : index
    %c0_36 = arith.constant 0 : index
    %52 = vector.load %arg6[%c4, %c0_35, %c0_36] : memref<12x7x40xf32, #tpu.memory_space<vmem>>, vector<1x7x40xf32>
    %53 = vector.shape_cast %52 : vector<1x7x40xf32> to vector<7x40xf32>
    %cst_37 = arith.constant dense<0.000000e+00> : vector<5x40xf32>
    %54 = tpu.matmul %51, %53, %cst_37 {dimension_numbers = #tpu.dot_dimension_numbers<[1], [0], [0], [1], [0, 0, 1, 1], [], []>} : vector<5x7xf32>, vector<7x40xf32>, vector<5x40xf32> -> vector<5x40xf32>
    %55 = arith.addf %50, %54 : vector<5x40xf32>
    %56 = vector.extract_strided_slice %31 {offsets = [2, 7], sizes = [5, 7], strides = [1, 1]} : vector<7x28xf32> to vector<5x7xf32>
    %c5 = arith.constant 5 : index
    %c0_38 = arith.constant 0 : index
    %c0_39 = arith.constant 0 : index
    %57 = vector.load %arg6[%c5, %c0_38, %c0_39] : memref<12x7x40xf32, #tpu.memory_space<vmem>>, vector<1x7x40xf32>
    %58 = vector.shape_cast %57 : vector<1x7x40xf32> to vector<7x40xf32>
    %cst_40 = arith.constant dense<0.000000e+00> : vector<5x40xf32>
    %59 = tpu.matmul %56, %58, %cst_40 {dimension_numbers = #tpu.dot_dimension_numbers<[1], [0], [0], [1], [0, 0, 1, 1], [], []>} : vector<5x7xf32>, vector<7x40xf32>, vector<5x40xf32> -> vector<5x40xf32>
    %60 = arith.addf %55, %59 : vector<5x40xf32>
    %61 = vector.extract_strided_slice %31 {offsets = [0, 14], sizes = [5, 7], strides = [1, 1]} : vector<7x28xf32> to vector<5x7xf32>
    %c6 = arith.constant 6 : index
    %c0_41 = arith.constant 0 : index
    %c0_42 = arith.constant 0 : index
    %62 = vector.load %arg6[%c6, %c0_41, %c0_42] : memref<12x7x40xf32, #tpu.memory_space<vmem>>, vector<1x7x40xf32>
    %63 = vector.shape_cast %62 : vector<1x7x40xf32> to vector<7x40xf32>
    %cst_43 = arith.constant dense<0.000000e+00> : vector<5x40xf32>
    %64 = tpu.matmul %61, %63, %cst_43 {dimension_numbers = #tpu.dot_dimension_numbers<[1], [0], [0], [1], [0, 0, 1, 1], [], []>} : vector<5x7xf32>, vector<7x40xf32>, vector<5x40xf32> -> vector<5x40xf32>
    %65 = arith.addf %60, %64 : vector<5x40xf32>
    %66 = vector.extract_strided_slice %31 {offsets = [1, 14], sizes = [5, 7], strides = [1, 1]} : vector<7x28xf32> to vector<5x7xf32>
    %c7 = arith.constant 7 : index
    %c0_44 = arith.constant 0 : index
    %c0_45 = arith.constant 0 : index
    %67 = vector.load %arg6[%c7, %c0_44, %c0_45] : memref<12x7x40xf32, #tpu.memory_space<vmem>>, vector<1x7x40xf32>
    %68 = vector.shape_cast %67 : vector<1x7x40xf32> to vector<7x40xf32>
    %cst_46 = arith.constant dense<0.000000e+00> : vector<5x40xf32>
    %69 = tpu.matmul %66, %68, %cst_46 {dimension_numbers = #tpu.dot_dimension_numbers<[1], [0], [0], [1], [0, 0, 1, 1], [], []>} : vector<5x7xf32>, vector<7x40xf32>, vector<5x40xf32> -> vector<5x40xf32>
    %70 = arith.addf %65, %69 : vector<5x40xf32>
    %71 = vector.extract_strided_slice %31 {offsets = [2, 14], sizes = [5, 7], strides = [1, 1]} : vector<7x28xf32> to vector<5x7xf32>
    %c8 = arith.constant 8 : index
    %c0_47 = arith.constant 0 : index
    %c0_48 = arith.constant 0 : index
    %72 = vector.load %arg6[%c8, %c0_47, %c0_48] : memref<12x7x40xf32, #tpu.memory_space<vmem>>, vector<1x7x40xf32>
    %73 = vector.shape_cast %72 : vector<1x7x40xf32> to vector<7x40xf32>
    %cst_49 = arith.constant dense<0.000000e+00> : vector<5x40xf32>
    %74 = tpu.matmul %71, %73, %cst_49 {dimension_numbers = #tpu.dot_dimension_numbers<[1], [0], [0], [1], [0, 0, 1, 1], [], []>} : vector<5x7xf32>, vector<7x40xf32>, vector<5x40xf32> -> vector<5x40xf32>
    %75 = arith.addf %70, %74 : vector<5x40xf32>
    %76 = vector.extract_strided_slice %31 {offsets = [0, 21], sizes = [5, 7], strides = [1, 1]} : vector<7x28xf32> to vector<5x7xf32>
    %c9 = arith.constant 9 : index
    %c0_50 = arith.constant 0 : index
    %c0_51 = arith.constant 0 : index
    %77 = vector.load %arg6[%c9, %c0_50, %c0_51] : memref<12x7x40xf32, #tpu.memory_space<vmem>>, vector<1x7x40xf32>
    %78 = vector.shape_cast %77 : vector<1x7x40xf32> to vector<7x40xf32>
    %cst_52 = arith.constant dense<0.000000e+00> : vector<5x40xf32>
    %79 = tpu.matmul %76, %78, %cst_52 {dimension_numbers = #tpu.dot_dimension_numbers<[1], [0], [0], [1], [0, 0, 1, 1], [], []>} : vector<5x7xf32>, vector<7x40xf32>, vector<5x40xf32> -> vector<5x40xf32>
    %80 = arith.addf %75, %79 : vector<5x40xf32>
    %81 = vector.extract_strided_slice %31 {offsets = [1, 21], sizes = [5, 7], strides = [1, 1]} : vector<7x28xf32> to vector<5x7xf32>
    %c10 = arith.constant 10 : index
    %c0_53 = arith.constant 0 : index
    %c0_54 = arith.constant 0 : index
    %82 = vector.load %arg6[%c10, %c0_53, %c0_54] : memref<12x7x40xf32, #tpu.memory_space<vmem>>, vector<1x7x40xf32>
    %83 = vector.shape_cast %82 : vector<1x7x40xf32> to vector<7x40xf32>
    %cst_55 = arith.constant dense<0.000000e+00> : vector<5x40xf32>
    %84 = tpu.matmul %81, %83, %cst_55 {dimension_numbers = #tpu.dot_dimension_numbers<[1], [0], [0], [1], [0, 0, 1, 1], [], []>} : vector<5x7xf32>, vector<7x40xf32>, vector<5x40xf32> -> vector<5x40xf32>
    %85 = arith.addf %80, %84 : vector<5x40xf32>
    %86 = vector.extract_strided_slice %31 {offsets = [2, 21], sizes = [5, 7], strides = [1, 1]} : vector<7x28xf32> to vector<5x7xf32>
    %c11 = arith.constant 11 : index
    %c0_56 = arith.constant 0 : index
    %c0_57 = arith.constant 0 : index
    %87 = vector.load %arg6[%c11, %c0_56, %c0_57] : memref<12x7x40xf32, #tpu.memory_space<vmem>>, vector<1x7x40xf32>
    %88 = vector.shape_cast %87 : vector<1x7x40xf32> to vector<7x40xf32>
    %cst_58 = arith.constant dense<0.000000e+00> : vector<5x40xf32>
    %89 = tpu.matmul %86, %88, %cst_58 {dimension_numbers = #tpu.dot_dimension_numbers<[1], [0], [0], [1], [0, 0, 1, 1], [], []>} : vector<5x7xf32>, vector<7x40xf32>, vector<5x40xf32> -> vector<5x40xf32>
    %90 = arith.addf %85, %89 : vector<5x40xf32>
    %c0_59 = arith.constant 0 : index
    %c0_60 = arith.constant 0 : index
    %91 = vector.load %arg7[%c0_59, %c0_60] : memref<1x40xf32, #tpu.memory_space<vmem>>, vector<1x40xf32>
    %92 = vector.broadcast %91 : vector<1x40xf32> to vector<5x40xf32>
    %93 = arith.addf %90, %92 : vector<5x40xf32>
    %cst_61 = arith.constant 0.000000e+00 : f32
    %94 = vector.broadcast %cst_61 : f32 to vector<5x40xf32>
    %95 = arith.maximumf %93, %94 : vector<5x40xf32>
    %96 = vector.extract_strided_slice %95 {offsets = [0, 0], sizes = [4, 39], strides = [1, 1]} : vector<5x40xf32> to vector<4x39xf32>
    %97 = vector.extract_strided_slice %95 {offsets = [0, 1], sizes = [4, 39], strides = [1, 1]} : vector<5x40xf32> to vector<4x39xf32>
    %98 = arith.maximumf %96, %97 : vector<4x39xf32>
    %99 = vector.extract_strided_slice %95 {offsets = [1, 0], sizes = [4, 39], strides = [1, 1]} : vector<5x40xf32> to vector<4x39xf32>
    %100 = vector.extract_strided_slice %95 {offsets = [1, 1], sizes = [4, 39], strides = [1, 1]} : vector<5x40xf32> to vector<4x39xf32>
    %101 = arith.maximumf %99, %100 : vector<4x39xf32>
    %102 = arith.maximumf %98, %101 : vector<4x39xf32>
    %c0_62 = arith.constant 0 : index
    %c0_63 = arith.constant 0 : index
    %103 = vector.load %arg8[%c0_62, %c0_63] : memref<2x4xf32, #tpu.memory_space<vmem>>, vector<2x4xf32>
    %c0_64 = arith.constant 0 : index
    %c0_65 = arith.constant 0 : index
    %104 = vector.load %arg9[%c0_64, %c0_65] : memref<39x16xf32, #tpu.memory_space<vmem>>, vector<39x16xf32>
    %cst_66 = arith.constant dense<0.000000e+00> : vector<4x16xf32>
    %105 = tpu.matmul %102, %104, %cst_66 {dimension_numbers = #tpu.dot_dimension_numbers<[1], [0], [0], [1], [0, 0, 1, 1], [], []>} : vector<4x39xf32>, vector<39x16xf32>, vector<4x16xf32> -> vector<4x16xf32>
    %cst_67 = arith.constant dense<0.000000e+00> : vector<2x16xf32>
    %106 = tpu.matmul %103, %105, %cst_67 {dimension_numbers = #tpu.dot_dimension_numbers<[1], [0], [0], [1], [0, 0, 1, 1], [], []>} : vector<2x4xf32>, vector<4x16xf32>, vector<2x16xf32> -> vector<2x16xf32>
    %c0_68 = arith.constant 0 : index
    %c0_69 = arith.constant 0 : index
    %107 = vector.load %arg11[%c0_68, %c0_69] : memref<1x32xf32, #tpu.memory_space<vmem>>, vector<1x32xf32>
    %108 = vector.extract_strided_slice %106 {offsets = [0, 0], sizes = [1, 16], strides = [1, 1]} : vector<2x16xf32> to vector<1x16xf32>
    %c0_70 = arith.constant 0 : index
    %c0_71 = arith.constant 0 : index
    %c0_72 = arith.constant 0 : index
    %109 = vector.load %arg10[%c0_70, %c0_71, %c0_72] : memref<2x16x32xf32, #tpu.memory_space<vmem>>, vector<1x16x32xf32>
    %110 = vector.shape_cast %109 : vector<1x16x32xf32> to vector<16x32xf32>
    %cst_73 = arith.constant dense<0.000000e+00> : vector<1x32xf32>
    %111 = tpu.matmul %108, %110, %cst_73 {dimension_numbers = #tpu.dot_dimension_numbers<[1], [0], [0], [1], [0, 0, 1, 1], [], []>} : vector<1x16xf32>, vector<16x32xf32>, vector<1x32xf32> -> vector<1x32xf32>
    %112 = arith.addf %107, %111 : vector<1x32xf32>
    %113 = vector.extract_strided_slice %106 {offsets = [1, 0], sizes = [1, 16], strides = [1, 1]} : vector<2x16xf32> to vector<1x16xf32>
    %c1_74 = arith.constant 1 : index
    %c0_75 = arith.constant 0 : index
    %c0_76 = arith.constant 0 : index
    %114 = vector.load %arg10[%c1_74, %c0_75, %c0_76] : memref<2x16x32xf32, #tpu.memory_space<vmem>>, vector<1x16x32xf32>
    %115 = vector.shape_cast %114 : vector<1x16x32xf32> to vector<16x32xf32>
    %cst_77 = arith.constant dense<0.000000e+00> : vector<1x32xf32>
    %116 = tpu.matmul %113, %115, %cst_77 {dimension_numbers = #tpu.dot_dimension_numbers<[1], [0], [0], [1], [0, 0, 1, 1], [], []>} : vector<1x16xf32>, vector<16x32xf32>, vector<1x32xf32> -> vector<1x32xf32>
    %117 = arith.addf %112, %116 : vector<1x32xf32>
    %cst_78 = arith.constant 0.000000e+00 : f32
    %118 = vector.broadcast %cst_78 : f32 to vector<1x32xf32>
    %119 = arith.maximumf %117, %118 : vector<1x32xf32>
    %c0_79 = arith.constant 0 : index
    %c0_80 = arith.constant 0 : index
    %120 = vector.load %arg12[%c0_79, %c0_80] : memref<32x16xf32, #tpu.memory_space<vmem>>, vector<32x16xf32>
    %cst_81 = arith.constant dense<0.000000e+00> : vector<1x16xf32>
    %121 = tpu.matmul %119, %120, %cst_81 {dimension_numbers = #tpu.dot_dimension_numbers<[1], [0], [0], [1], [0, 0, 1, 1], [], []>} : vector<1x32xf32>, vector<32x16xf32>, vector<1x16xf32> -> vector<1x16xf32>
    %c0_82 = arith.constant 0 : index
    %c0_83 = arith.constant 0 : index
    %122 = vector.load %arg13[%c0_82, %c0_83] : memref<1x16xf32, #tpu.memory_space<vmem>>, vector<1x16xf32>
    %123 = arith.addf %121, %122 : vector<1x16xf32>
    %cst_84 = arith.constant 0.000000e+00 : f32
    %124 = vector.broadcast %cst_84 : f32 to vector<1x16xf32>
    %125 = arith.maximumf %123, %124 : vector<1x16xf32>
    %c0_85 = arith.constant 0 : index
    %c0_86 = arith.constant 0 : index
    %126 = vector.load %arg14[%c0_85, %c0_86] : memref<16x10xf32, #tpu.memory_space<vmem>>, vector<16x10xf32>
    %cst_87 = arith.constant dense<0.000000e+00> : vector<1x10xf32>
    %127 = tpu.matmul %125, %126, %cst_87 {dimension_numbers = #tpu.dot_dimension_numbers<[1], [0], [0], [1], [0, 0, 1, 1], [], []>} : vector<1x16xf32>, vector<16x10xf32>, vector<1x10xf32> -> vector<1x10xf32>
    %c0_88 = arith.constant 0 : index
    %c0_89 = arith.constant 0 : index
    %128 = vector.load %arg15[%c0_88, %c0_89] : memref<1x10xf32, #tpu.memory_space<vmem>>, vector<1x10xf32>
    %129 = arith.addf %127, %128 : vector<1x10xf32>
    %cst_90 = arith.constant dense<0xFF800000> : vector<1xf32>
    %130 = vector.multi_reduction <maximumf>, %129, %cst_90 [1] : vector<1x10xf32> to vector<1xf32>
    %131 = vector.shape_cast %130 : vector<1xf32> to vector<1x1xf32>
    %132 = vector.broadcast %131 : vector<1x1xf32> to vector<1x10xf32>
    %133 = arith.subf %129, %132 : vector<1x10xf32>
    %134 = math.exp %133 : vector<1x10xf32>
    %cst_91 = arith.constant dense<0.000000e+00> : vector<1xf32>
    %135 = vector.multi_reduction <add>, %134, %cst_91 [1] : vector<1x10xf32> to vector<1xf32>
    %136 = vector.shape_cast %135 : vector<1xf32> to vector<1x1xf32>
    %137 = math.log %136 : vector<1x1xf32>
    %138 = vector.broadcast %137 : vector<1x1xf32> to vector<1x10xf32>
    %139 = arith.subf %133, %138 : vector<1x10xf32>
    %c0_92 = arith.constant 0 : index
    %c0_93 = arith.constant 0 : index
    %c0_94 = arith.constant 0 : index
    %140 = vector.load %arg16[%c0_92, %c0_93, %c0_94] : memref<1x1x10xf32, #tpu.memory_space<vmem>>, vector<1x1x10xf32>
    %141 = vector.shape_cast %140 : vector<1x1x10xf32> to vector<1x10xf32>
    %142 = vector.shape_cast %139 : vector<1x10xf32> to vector<1x1x10xf32>
    tpu.vector_store %arg16[%c0_92, %c0_93, %c0_94], %142 {strides = array<i32>} : memref<1x1x10xf32, #tpu.memory_space<vmem>>, vector<1x1x10xf32>,
    return
  }
  func.func @transform_0(%arg0: i32) -> (i32, i32, i32) {
    %c0_i32 = arith.constant 0 : i32
    %c0_i32_0 = arith.constant 0 : i32
    %c0_i32_1 = arith.constant 0 : i32
    return %arg0, %c0_i32, %c0_i32_0 : i32, i32, i32
  }
  func.func @transform_1(%arg0: i32) -> (i32, i32, i32) {
    %c0_i32 = arith.constant 0 : i32
    %c0_i32_0 = arith.constant 0 : i32
    %c0_i32_1 = arith.constant 0 : i32
    %c0_i32_2 = arith.constant 0 : i32
    return %c0_i32, %c0_i32_0, %c0_i32_1 : i32, i32, i32
  }
  func.func @transform_2(%arg0: i32) -> (i32, i32) {
    %c0_i32 = arith.constant 0 : i32
    %c0_i32_0 = arith.constant 0 : i32
    %c0_i32_1 = arith.constant 0 : i32
    return %c0_i32, %c0_i32_0 : i32, i32
  }
  func.func @transform_3(%arg0: i32) -> (i32, i32) {
    %c0_i32 = arith.constant 0 : i32
    %c0_i32_0 = arith.constant 0 : i32
    %c0_i32_1 = arith.constant 0 : i32
    return %c0_i32, %c0_i32_0 : i32, i32
  }
  func.func @transform_4(%arg0: i32) -> (i32, i32) {
    %c0_i32 = arith.constant 0 : i32
    %c0_i32_0 = arith.constant 0 : i32
    %c0_i32_1 = arith.constant 0 : i32
    return %c0_i32, %c0_i32_0 : i32, i32
  }
  func.func @transform_5(%arg0: i32) -> (i32, i32, i32) {
    %c0_i32 = arith.constant 0 : i32
    %c0_i32_0 = arith.constant 0 : i32
    %c0_i32_1 = arith.constant 0 : i32
    %c0_i32_2 = arith.constant 0 : i32
    return %c0_i32, %c0_i32_0, %c0_i32_1 : i32, i32, i32
  }
  func.func @transform_6(%arg0: i32) -> (i32, i32) {
    %c0_i32 = arith.constant 0 : i32
    %c0_i32_0 = arith.constant 0 : i32
    %c0_i32_1 = arith.constant 0 : i32
    return %c0_i32, %c0_i32_0 : i32, i32
  }
  func.func @transform_7(%arg0: i32) -> (i32, i32) {
    %c0_i32 = arith.constant 0 : i32
    %c0_i32_0 = arith.constant 0 : i32
    %c0_i32_1 = arith.constant 0 : i32
    return %c0_i32, %c0_i32_0 : i32, i32
  }
  func.func @transform_8(%arg0: i32) -> (i32, i32) {
    %c0_i32 = arith.constant 0 : i32
    %c0_i32_0 = arith.constant 0 : i32
    %c0_i32_1 = arith.constant 0 : i32
    return %c0_i32, %c0_i32_0 : i32, i32
  }
  func.func @transform_9(%arg0: i32) -> (i32, i32, i32) {
    %c0_i32 = arith.constant 0 : i32
    %c0_i32_0 = arith.constant 0 : i32
    %c0_i32_1 = arith.constant 0 : i32
    %c0_i32_2 = arith.constant 0 : i32
    return %c0_i32, %c0_i32_0, %c0_i32_1 : i32, i32, i32
  }
  func.func @transform_10(%arg0: i32) -> (i32, i32) {
    %c0_i32 = arith.constant 0 : i32
    %c0_i32_0 = arith.constant 0 : i32
    %c0_i32_1 = arith.constant 0 : i32
    return %c0_i32, %c0_i32_0 : i32, i32
  }
  func.func @transform_11(%arg0: i32) -> (i32, i32) {
    %c0_i32 = arith.constant 0 : i32
    %c0_i32_0 = arith.constant 0 : i32
    %c0_i32_1 = arith.constant 0 : i32
    return %c0_i32, %c0_i32_0 : i32, i32
  }
  func.func @transform_12(%arg0: i32) -> (i32, i32) {
    %c0_i32 = arith.constant 0 : i32
    %c0_i32_0 = arith.constant 0 : i32
    %c0_i32_1 = arith.constant 0 : i32
    return %c0_i32, %c0_i32_0 : i32, i32
  }
  func.func @transform_13(%arg0: i32) -> (i32, i32) {
    %c0_i32 = arith.constant 0 : i32
    %c0_i32_0 = arith.constant 0 : i32
    %c0_i32_1 = arith.constant 0 : i32
    return %c0_i32, %c0_i32_0 : i32, i32
  }
  func.func @transform_14(%arg0: i32) -> (i32, i32) {
    %c0_i32 = arith.constant 0 : i32
    %c0_i32_0 = arith.constant 0 : i32
    %c0_i32_1 = arith.constant 0 : i32
    return %c0_i32, %c0_i32_0 : i32, i32
  }
  func.func @transform_15(%arg0: i32) -> (i32, i32, i32) {
    %c0_i32 = arith.constant 0 : i32
    %c0_i32_0 = arith.constant 0 : i32
    %c0_i32_1 = arith.constant 0 : i32
    return %arg0, %c0_i32, %c0_i32_0 : i32, i32, i32
  }
}

</mosaic_0001>

<bundles_post_ra>
// kernel: cnn_forward.1
= control target key start
LH: loop header
LB: loop body
LE: loop exit
PB: predicated region body
PF: predicated region fallthrough
CT: control target
= control target key end

     0   :  { %s2424_s0 = inlined_call_operand.hbm [shape: f32[2,16,16], index: 0, kind: input, shape index: {}]   ;;  %s2425_s1 = inlined_call_operand.vmem [shape: f32[3,16,56], index: 1, kind: input, shape index: {}]   ;;  %s2426_s2 = inlined_call_operand.hbm [shape: f32[1,56], index: 2, kind: input, shape index: {}]   ;;  %s2427_s3 = inlined_call_operand.hbm [shape: f32[7,13], index: 3, kind: input, shape index: {}]   ;;  %s2428_s4 = inlined_call_operand.vmem [shape: f32[55,28], index: 4, kind: input, shape index: {}]   ;;  %s2429_s5 = inlined_call_operand.vmem [shape: f32[12,7,40], index: 5, kind: input, shape index: {}]   ;;  %s2430_s6 = inlined_call_operand.hbm [shape: f32[1,40], index: 6, kind: input, shape index: {}]   ;;  %s2431_s7 = inlined_call_operand.vmem [shape: f32[2,4], index: 7, kind: input, shape index: {}]   ;;  %s2432_s8 = inlined_call_operand.vmem [shape: f32[39,16], index: 8, kind: input, shape index: {}]   ;;  %s2433_s9 = inlined_call_operand.hbm [shape: f32[2,16,32], index: 9, kind: input, shape index: {}]   ;;  %s2434_s10 = inlined_call_operand.hbm [shape: f32[1,32], index: 10, kind: input, shape index: {}]   ;;  %s2435_s11 = inlined_call_operand.vmem [shape: f32[32,16], index: 11, kind: input, shape index: {}]   ;;  %s2436_s12 = inlined_call_operand.vmem [shape: f32[1,16], index: 12, kind: input, shape index: {}]   ;;  %s2437_s13 = inlined_call_operand.hbm [shape: f32[16,10], index: 13, kind: input, shape index: {}]   ;;  %s2438_s14 = inlined_call_operand.vmem [shape: f32[1,10], index: 14, kind: input, shape index: {}]   ;;  %s2439_s15 = inlined_call_operand.hbm [shape: f32[2,1,10], index: 15, kind: output, shape index: {}]  }
   0x1   :  { %2443 = sst [smem:[#allocation21_spill]] %s2426_s2 }
   0x2   :  { %2444 = sst [smem:[#allocation22_spill]] %s2427_s3 }
   0x3   :  { %2445 = sst [smem:[#allocation23_spill]] %s2430_s6 }
   0x4   :  { %2446 = sst [smem:[#allocation24_spill]] %s2433_s9 }
   0x5   :  { %2447 = sst [smem:[#allocation25_spill]] %s2434_s10 }
   0x6   :  { %2448 = sst [smem:[#allocation26_spill]] %s2436_s12 }
   0x7   :  { %2449 = sst [smem:[#allocation27_spill]] %s2437_s13 }
   0x8   :  { %2450 = sst [smem:[#allocation28_spill]] %s2438_s14 }
   0x9   :  { %2451 = sst [smem:[#allocation29_spill]] %s2439_s15 }
   0xa   :  { %20 = vsyncpa [#allocation3], 0 }
   0xb   :  { %22 = vsyncpa [#allocation3 + $0x1], 0 }
   0xc   :  { %23 = vsyncpa [#allocation6], 0 }
   0xd   :  { %24 = vsyncpa [#allocation9], 0 }
   0xe   :  { %25 = vsyncpa [#allocation12], 0 }
   0xf   :  { %26 = vsyncpa [#allocation4], 0 }
  0x10   :  { %28 = vsyncpa [#allocation4 + $0x1], 0  ;;  %s2079_s18 = smov 0   ;;  %s2081_s19 = smov 0  }
  0x11   :  { %s2083_s20 = smov 0   ;;  %s2085_s21 = smov 0  }
  0x12 LB: > { %s2452_s2 = sld [smem:[#allocation21_spill]]  ;;  %s2103_s25 = sadd.s32 4294967295, %s1985_s21   ;;  %s1985_s21 = sphi %s2085_s21, %s2476_s21   ;;  %s1981_s20 = sphi %s2083_s20, %s2475_s20   ;;  %s1977_s19 = sphi %s2081_s19, %s2474_s19   ;;  %s1973_s18 = sphi %s2079_s18, %s2473_s18  }
  0x13   : > { %p1498_p0 = scmp.ge.s32.totalorder %s1985_s21, 1  ;;  %p55_p1 = scmp.eq.s32.totalorder %s2103_s25, 0 }
  0x14   : > { %p385_p2 = scmp.lt.s32.totalorder %s1985_s21, 3  ;;  %s1987_s27 = smov [#allocation5]  }
  0x15   : > { %s402_s28 = sshll.u32 %s1987_s27, 4  ;;  %s2454_s6 = sld [smem:[#allocation23_spill]]  ;;  %s403_s28 = int_to_ptr.vmem [resolvable:$true] %s402_s28 }
  0x16   : > { %p2108_p3 = pnand %p1498_p0, %p385_p2  ;;  %s1988_s22 = smov [#allocation8]  }
  0x17   : > { %s432_s23 = sshll.u32 %s1988_s22, 4  ;;  %s2456_s10 = sld [smem:[#allocation25_spill]]  ;;  %s433_s23 = int_to_ptr.vmem [resolvable:$true] %s432_s23 }
  0x18   : > { %s400_s24 = sshll.u32 %s2452_s2, 4  ;;  %p1606_p5 = pneg %p2108_p3  ;;  %s401_s24 = int_to_ptr.hbm [resolvable:$true] %s400_s24 }
  0x19   : > { %s2457_s3 = sld [smem:[#allocation22_spill]]  ;;  %s1989_s14 = smov [#allocation11]  }
  0x1a   : > { %p2120_p6 = pnand %p1606_p5, %p55_p1  ;;  %s464_s12 = sshll.u32 %s1989_s14, 4  ;;  %s465_s12 = int_to_ptr.vmem [resolvable:$true] %s464_s12 }
  0x1b   : > { %s430_s16 = sshll.u32 %s2454_s6, 4  ;;  %s1990_s22 = smov [#allocation7]   ;;  %s431_s16 = int_to_ptr.hbm [resolvable:$true] %s430_s16 }
  0x1c   : > { %1609 = dma.hbm_to_vmem [thread:$0]  (!%p2120_p6), %s401_s24, 16, %s403_s28, [#allocation6]  }
  0x1d   : > { %s462_s15 = sshll.u32 %s2456_s10, 4  ;;  %s414_s2 = sshll.u32 %s1990_s22, 4  ;;  %s463_s15 = int_to_ptr.hbm [resolvable:$true] %s462_s15  ;;  %s415_s2 = int_to_ptr.vmem [resolvable:$true] %s414_s2 }
  0x1e   : > { %1615 = dma.hbm_to_vmem [thread:$0]  (!%p2120_p6), %s431_s16, 16, %s433_s23, [#allocation9]  }
  0x1f   : > { %s412_s6 = sshll.u32 %s2457_s3, 4  ;;  %s2458_s9 = sld [smem:[#allocation24_spill]]  ;;  %s413_s6 = int_to_ptr.hbm [resolvable:$true] %s412_s6 }
  0x20   : > { %1621 = dma.hbm_to_vmem [thread:$0]  (!%p2120_p6), %s463_s15, 16, %s465_s12, [#allocation12]  }
  0x21   : > { %1612 = dma.hbm_to_vmem [thread:$0]  (!%p2120_p6), %s413_s6, 128, %s415_s2, [#allocation6]  }
  0x22   : > { %s1991_s14 = smov [#allocation10]   ;;  %s2459_s13 = sld [smem:[#allocation27_spill]] }
  0x23   : > { %s449_s28 = sshll.u32 %s1991_s14, 4  ;;  %s2441_s16 = smov 128   ;;  %s450_s28 = int_to_ptr.vmem [resolvable:$true] %s449_s28 }
  0x24   : > { %s2442_s23 = smov 8   ;;  %s1994_s6 = smov [#allocation13]  }
  0x25   : > { %s447_s24 = sshll.u32 %s2458_s9, 4  ;;  %s481_s29 = sshll.u32 %s1994_s6, 4  ;;  %s448_s24 = int_to_ptr.hbm [resolvable:$true] %s447_s24  ;;  %s482_s29 = int_to_ptr.vmem [resolvable:$true] %s481_s29 }
  0x26   : > { %1618 = dma.hbm_to_vmem [thread:$0]  (!%p2120_p6), %s448_s24, 512, %s450_s28, [#allocation9], %s2441_s16, %s2441_s16, %s2442_s23  }
  0x27   : > { %s1497_s30 = sadd.s32 4294967294, %s1985_s21   ;;  %s2156_s22 = sadd.s32 1, %s1985_s21  }
  0x28   : > { %s479_s10 = sshll.u32 %s2459_s13, 4  ;;  %s38_s2 = ssub.s32 %s1985_s21, %s2156_s22  ;;  %s480_s10 = int_to_ptr.hbm [resolvable:$true] %s479_s10 }
  0x29   : > { %1624 = dma.hbm_to_vmem [thread:$0]  (!%p2120_p6), %s480_s10, 256, %s482_s29, [#allocation12], %s2441_s16, %s2441_s16, %s2442_s23  }
  0x2a   : > { %s41_s27 = sadd.s32 1, %s1981_s20  ;;  %p39_p7 = scmp.eq.s32.totalorder %s38_s2, 0 }
  0x2b   : > { %p48_p8 = scmp.ne.s32.totalorder %s1981_s20, %s1977_s19  ;;  %p49_p9 = scmp.eq.s32.totalorder %s1985_s21, 0 }
  0x2c   : > { %p54_p10 = scmp.ne.s32.totalorder %s1977_s19, %s1973_s18  ;;  %p372_p13 = scmp.eq.s32.totalorder %s2103_s25, 1 }
  0x2d   : > { %s2167_s24 = scalar_select %p39_p7, %s1981_s20, %s41_s27  }
  0x2e   : > { %p2169_p11 = por %p49_p9, %p48_p8  ;;  %p2175_p12 = por %p55_p1, %p54_p10 }
  0x2f   : > { %2460 = sst [smem:[#allocation20_spill]] %s2167_s24  ;;  %p378_p0 = scmp.eq.s32.totalorder %s1497_s30, 1 }
  0x30   : > { %p1639_p2 = scmp.lt.s32.totalorder %s1985_s21, 2  ;;  %s498_s28 = sand.u32 1, %s1981_s20  }
  0x31   : > { %p2182_p5 = por %p372_p13, %p48_p8  ;;  %p2186_p6 = por %p378_p0, %p54_p10 }
  0x32   : > { %s1506_s10 = sshll.u32 %s498_s28, 4  ;;  %s1577_s6 = sshll.u32 %s1985_s21, 4 }
  0x33   : > { %s507_s27 = scalar_lea.hbm %s2424_s0, %s1577_s6  ;;  %s502_s16 = scalar_lea.vmem [#allocation2], %s1506_s10 }
  0x34   : > { %s510_s23 = sshll.u32 %s502_s16, 4  ;;  %s508_s3 = sshll.u32 %s507_s27, 4  ;;  %s511_s23 = int_to_ptr.vmem [resolvable:$true] %s510_s23  ;;  %s509_s3 = int_to_ptr.hbm [resolvable:$true] %s508_s3 }
  0x35   : > { %p2196_p7 = pnand %p1639_p2, %p2169_p11  ;;  %s499_s9 = scalar_lea.sflag [#allocation3], %s498_s28 }
  0x36   : > { %s1877_s13 = sshra.s32 %s509_s3, 4  ;;  %s1884_s6 = scalar_lea.hbm %s2424_s0, 32  ;;  %s1878_s13 = int_to_ptr.hbm [resolvable:$true] %s1877_s13 }
  0x37   : > { %s1879_s24 = scalar_lea.hbm %s1878_s13, 16  ;;  %p1881_p9 = pneg %p2196_p7 }
  0x38   : > { %p1880_p8 = scmp.ne.s32.totalorder %s1878_s13, %s1879_s24  ;;  %p1885_p11 = scmp.lt.s32.totalorder %s1878_s13, %s2424_s0 }
  0x39   : > { %p1886_p0 = scmp.lt.s32.totalorder %s1884_s6, %s1879_s24 }
  0x3a   : > { %p1882_p10 = pnand %p1881_p9, %p1880_p8 }
  0x3b   : > { %p1887_p2 = por %p1886_p0, %p1885_p11 }
  0x3c   : > { %p1883_p13 = pneg %p1882_p10 }
  0x3e   : > { %p1888_p4 = pnand %p1887_p2, %p1883_p13 }
  0x40   : > { %1891 = shalt.err (!%p1888_p4)
}
  0x41   : > { %s2466_s28 = smov 8   ;;  %s2467_s2 = smov 128  }
  0x42   : > { %1628 = dma.hbm_to_vmem [thread:$0]  (!%p2196_p7), %s509_s3, 256, %s511_s23, %s499_s9, %s2467_s2, %s2467_s2, %s2466_s28  }
  0x43   : > { %522 = sbr.rel (%p2108_p3) target bundleno = 1920 (0x780), region = 80  ;;  %s2216_s27 = sand.u32 (!%p2108_p3), 1, %s1977_s19  }
  0x44   : > { %s1510_s13 = sshll.u32 (!%p2108_p3), %s2216_s27, 4  ;;  %s525_s24 = scalar_lea.sflag (!%p2108_p3), [#allocation3], %s2216_s27 }
  0x45   : > { %s528_s10 = scalar_lea.vmem (!%p2108_p3), [#allocation2], %s1510_s13 }
  0x48   : > { %1952 = dma.done.wait (%p2175_p12), %s525_s24, 256  }
  0x49   : > { %1954 = vsyncadd (%p2175_p12), %s525_s24, 4294967040 }
  0x4a   : > { %1956 = dma.done.wait (%p55_p1), [#allocation6], 144  }
  0x4b   : > { %1958 = vsyncadd (%p55_p1), [#allocation6], 4294967152 }
  0x4c   : > { %1960 = dma.done.wait (%p55_p1), [#allocation9], 528  }
  0x4d   : > { %1962 = vsyncadd (%p55_p1), [#allocation9], 4294966768 }
  0x4e   : > { %1964 = dma.done.wait (%p55_p1), [#allocation12], 272  }
  0x4f   : > { %1966 = vsyncadd (%p55_p1), [#allocation12], 4294967024  ;;  %v1524_v0 = vld [vmem:[%s2425_s1 + $0x28] sm:$0xff]  ;;  %v1523_v1 = vld [vmem:[%s2425_s1 + $0x20] sm:$0xff]  ;;  %vm618_vm0 = vcmask 130048   ;;  %vm676_vm1 = vcmask 1045504  }
  0x50   : > { %v605_v2 = vld [vmem:[%s528_s10] sm:$0xff]  ;;  %698 = vmatpush.msra.mxu2 %v1524_v0  ;;  %v606_v3 = vld [vmem:[%s528_s10 + $0x8] sm:$0xff]  ;;  %vm614_vm2 = vcmask 1046528   ;;  %s1995_s13 = smov 127   ;;  %vm744_vm3 = vcmask 449536   ;;  %vm781_vm4 = vcmask 1044480  }
  0x51   : > { %v677_v4 = vrot.slane %v605_v2, 2  ;;  %v1518_v5 = vld [vmem:[%s2425_s1 + $0x18] sm:$0xff]  ;;  %v608_v6 = vld [vmem:[%s2425_s1 + $0x8] sm:$0xff]  ;;  %v615_v7 = vrot.slane %v605_v2, 1  ;;  %v678_v8 = vrot.slane %v606_v3, 2  ;;  %v1517_v9 = vld [vmem:[%s2425_s1 + $0x10] sm:$0xff] }
  0x52   : > { %637 = vmatpush.msra.mxu0 %v1518_v5  ;;  %664 = vmatpush.msra.mxu1 %v608_v6  ;;  %v607_v10 = vld [vmem:[%s2425_s1] sm:$0xff]  ;;  %v616_v11 = vrot.slane %v606_v3, 1  ;;  %v743_v29 = vld [vmem:[%s2428_s4 + $0x30] sm:$0x7f]  ;;  %v742_v30 = vld [vmem:[%s2428_s4 + $0x28] sm:$0xff]  ;;  %vm777_vm5 = vcmask 105472  }
  0x53   : > { %699 = vmatpush.msra.mxu2 %v1523_v1  ;;  %v679_v12 = vsel %vm676_vm1, %v677_v4, %v678_v8  ;;  %v1691_v17 = vld [vmem:[#allocation5] ss:$0 sm:$0xff]  ;;  %1527 = vmatpush.msk.msra.mxu3 %vm614_vm2, %v743_v29  ;;  %v740_v32 = vld [vmem:[%s2428_s4 + $0x18] sm:$0xff]  ;;  %v739_v33 = vld [vmem:[%s2428_s4 + $0x10] sm:$0xff]  ;;  %vm810_vm6 = vcmask 56320   ;;  %s1996_s16 = smov 114  }
  0x54   : > { %638 = vmatpush.msra.mxu0 %v1517_v9  ;;  %665 = vmatpush.msra.mxu1 %v607_v10  ;;  %v617_v13 = vsel %vm614_vm2, %v615_v7, %v616_v11  ;;  %v741_v31 = vld [vmem:[%s2428_s4 + $0x20] sm:$0xff]  ;;  %v738_v34 = vld [vmem:[%s2428_s4 + $0x8] sm:$0xff]  ;;  %v1537_v50 = vld [vmem:[%s2429_s5 + $0x10] sm:$0x7f]  ;;  %s1997_s6 = smov 121   ;;  %s1998_s29 = smov 107  }
  0x55   : > { %1525 = vmatmul.msk.f32.vlgmr.msra.gmra.mxu2 %vm618_vm0, %v679_v12  ;;  %1519 = vmatmul.msk.f32.vlgmr.msra.gmra.mxu0 %vm618_vm0, %v617_v13  ;;  %v737_v35 = vld [vmem:[%s2428_s4] sm:$0xff]  ;;  %v1532_v49 = vld [vmem:[%s2429_s5 + $0x8] sm:$0x7f]  ;;  %v1540_v51 = vld [vmem:[%s2429_s5 + $0x18] sm:$0x7f]  ;;  %vm1181_vm7 = vcmask 318464  }
  0x56   : > { %1521 = vmatmul.msk.f32.vlgmr.msra.gmra.mxu1 %vm618_vm0, %v605_v2  ;;  %764 = vmatpush.msra.mxu3 %v742_v30  ;;  %v736_v47 = vld [vmem:[#allocation7] sm:$0x7f]  ;;  %v1552_v55 = vld [vmem:[%s2429_s5 + $0x38] sm:$0x7f]  ;;  %v1549_v56 = vld [vmem:[%s2429_s5 + $0x30] sm:$0x7f] }
  0x57   : > { %v805_v48 = vld [vmem:[%s2429_s5] sm:$0x7f]  ;;  %1533 = vmatpush.msk.msrb.mxu1 %vm614_vm2, %v1532_v49  ;;  %v1546_v58 = vld [vmem:[%s2429_s5 + $0x28] sm:$0x7f]  ;;  %v1561_v59 = vld [vmem:[%s2429_s5 + $0x50] sm:$0x7f] }
  0x58   : > { %765 = vmatpush.msra.mxu3 %v741_v31  ;;  %1535 = vmatpush.msk.msrb.mxu2 %vm614_vm2, %v805_v48  ;;  %v1543_v57 = vld [vmem:[%s2429_s5 + $0x20] sm:$0x7f]  ;;  %v1558_v63 = vld [vmem:[%s2429_s5 + $0x48] sm:$0x7f]  ;;  %v1564_v1 = vld [vmem:[%s2429_s5 + $0x58] sm:$0x7f] }
  0x59   : > { %1541 = vmatpush.msk.msra.mxu1 %vm614_vm2, %v1540_v51  ;;  %v1555_v61 = vld [vmem:[%s2429_s5 + $0x40] sm:$0x7f]  ;;  %v1179_v10 = vld [vmem:[%s2432_s8 + $0x18] sm:$0xff]  ;;  %v1692_v31 = vld [vmem:[#allocation8] ss:$0 sm:$0xff]  ;;  %vm1212_vm8 = vcmask 1043456  }
  0x5a   : > { %766 = vmatpush.msra.mxu3 %v740_v32  ;;  %1544 = vmatpush.msk.msra.mxu2 %vm614_vm2, %v1543_v57  ;;  %v1180_v9 = vld [vmem:[%s2432_s8 + $0x20] sm:$0x7f]  ;;  %vm1208_vm9 = vcmask 31744   ;;  %v1294_v51 = vld [vmem:[%s2435_s11 + $0x18] sm:$0xff]  ;;  %vm1296_vm10 = vcmask 261120   ;;  %s2468_s14 = sld [smem:[#allocation26_spill]] }
  0x5b   : > { %v1264_v48 = vld [vmem:[#allocation10 + $0x10] sm:$0xff]  ;;  %vm1347_vm11 = vcmask 73728   ;;  %s2470_s17 = sld [smem:[#allocation29_spill]]  ;;  %s604_s2 = scalar_lea.vmem [#allocation14], %s2216_s27 }
  0x5c   : > { %767 = vmatpush.msra.mxu3 %v739_v33  ;;  %s1372_s24 = sshll.u32 %s604_s2, 4  ;;  %s1362_s3 = scalar_lea.sflag [#allocation4], %s2216_s27  ;;  %s1373_s24 = int_to_ptr.vmem [resolvable:$true] %s1372_s24 }
  0x5d   : > { %1526 = vmatmul.msk.f32.gmra.mxu2 %vm618_vm0, %v678_v8  ;;  %1520 = vmatmul.msk.f32.gmra.mxu0 %vm618_vm0, %v616_v11 }
  0x5e   : > { %1522 = vmatmul.msk.f32.gmra.mxu1 %vm618_vm0, %v606_v3  ;;  %768 = vmatpush.msra.mxu3 %v738_v34 }
  0x60   : > { %769 = vmatpush.msra.mxu3 %v737_v35 }
  0x61   : > { %s1370_s28 = scalar_lea.hbm %s2470_s17, %s2103_s25 }
  0x62   : > { %1547 = vmatpush.msk.msrb.mxu3 %vm614_vm2, %v1546_v58  ;;  %s1374_s10 = sshll.u32 %s1370_s28, 4  ;;  %s1375_s10 = int_to_ptr.hbm [resolvable:$true] %s1374_s10 }
  0x63   : > { %s1921_s9 = sshra.s32 %s1375_s10, 4  ;;  %s1922_s9 = int_to_ptr.hbm [resolvable:$true] %s1921_s9 }
  0x64   : > { %s1923_s26 = scalar_lea.hbm %s1922_s9, 1  ;;  %p1928_p12 = scmp.lt.s32.totalorder %s1922_s9, %s2470_s17 }
  0x65   : > { %p1924_p1 = scmp.ne.s32.totalorder %s1922_s9, %s1923_s26 }
  0x67   : > { %p1925_p3 = pnand %p1924_p1, %p2182_p5 }
  0x69   : > { %p1926_p4 = pneg %p1925_p3 }
  0xd2   : > { %v640_v14 = vpop.f32.mrf.mxu0 }
  0xd3   : > { %v667_v15 = vpop.f32.mrf.mxu1 }
  0xd4   : > { %v668_v16 = vadd.f32 %v667_v15, %v640_v14 }
  0xd8   : > { %v701_v18 = vpop.f32.mrf.mxu2 }
  0xd9   : > { %v707_v19 = vadd.f32 %v701_v18, %v668_v16 }
  0xda   : > { %v643_v20 = vpop.f32.mrf.mxu0 }
  0xdb   : > { %v670_v21 = vpop.f32.mrf.mxu1  ;;  %v713_v22 = vadd.f32 %v1691_v17, %v707_v19 }
  0xdc   : > { %v671_v23 = vadd.f32 %v670_v21, %v643_v20 }
  0xdd   : > { %v715_v24 = vmax.f32 %v713_v22, 0.0 }
  0xdf   : > { %719 = vrot.lane.b32.xlu0 %v715_v24, %s1995_s13 }
  0xe0   : > { %v704_v25 = vpop.f32.mrf.mxu2 }
  0xe1   : > { %v708_v26 = vadd.f32 %v704_v25, %v671_v23 }
  0xe3   : > { %v714_v27 = vadd.f32 %v1691_v17, %v708_v26 }
  0xe5   : > { %v716_v28 = vmax.f32 %v714_v27, 0.0 }
  0xe7   : > { %721 = vrot.lane.b32.xlu0 %v716_v28, %s1995_s13 }
 0x151   : > { %v720_v36 = vpop.permute.xlu0 %719 }
 0x152   : > { %v725_v37 = vmax.f32 %v715_v24, %v720_v36  ;;  %v1178_v36 = vld [vmem:[%s2432_s8 + $0x10] sm:$0xff] }
 0x154   : > { %v729_v40 = vrot.slane %v725_v37, 1 }
 0x159   : > { %v722_v38 = vpop.permute.xlu0 %721 }
 0x15a   : > { %v726_v39 = vmax.f32 %v716_v28, %v722_v38  ;;  %v1176_v38 = vld [vmem:[%s2432_s8] sm:$0xff] }
 0x15c   : > { %v730_v41 = vrot.slane %v726_v39, 1 }
 0x15e   : > { %v731_v42 = vsel %vm614_vm2, %v729_v40, %v730_v41  ;;  %v735_v44 = vmax.f32 %v726_v39, %v730_v41 }
 0x15f   : > { %v734_v43 = vmax.f32 %v725_v37, %v731_v42  ;;  %v1177_v37 = vld [vmem:[%s2432_s8 + $0x8] sm:$0xff] }
 0x161   : > { %1528 = vmatmul.msk.f32.vlgmr.msra.gmra.mxu3 %vm744_vm3, %v734_v43  ;;  %v1238_v43 = vld [vmem:[#allocation10 + $0x8] sm:$0xff] }
 0x162   : > { %1559 = vmatpush.msk.msra.mxu3 %vm614_vm2, %v1558_v63  ;;  %v1295_v63 = vld [vmem:[%s2468_s14] sm:$0x1]  ;;  %s1927_s14 = scalar_lea.hbm %s2470_s17, 2 }
 0x163   : > { %p1929_p7 = scmp.lt.s32.totalorder %s1927_s14, %s1923_s26 }
 0x165   : > { %p1930_p8 = por %p1929_p7, %p1928_p12 }
 0x167   : > { %p1931_p9 = pnand %p1930_p8, %p1926_p4 }
 0x169   : > { %1529 = vmatmul.msk.f32.gmra.mxu3 %vm744_vm3, %v735_v44  ;;  %v1175_v44 = vld [vmem:[%s2431_s7] sm:$0x3] }
 0x1e4   : > { %v771_v45 = vpop.f32.mrf.mxu3 }
 0x1ec   : > { %v774_v46 = vpop.f32.mrf.mxu3 }
 0x1ed   : > { %1530 = vmatpush.msk.msrb.mxu0 %vm781_vm4, %v774_v46  ;;  %v1237_v46 = vld [vmem:[#allocation10] sm:$0xff] }
 0x1ef   : > { %800 = vmatpush.msrb.mxu0 %v771_v45 }
 0x1f0   : > { %1531 = vmatmul.msk.f32.vlgmr.msrb.gmra.mxu0 %vm777_vm5, %v736_v47  ;;  %v1265_v47 = vld [vmem:[#allocation10 + $0x18] sm:$0xff] }
 0x1f1   : > { %1538 = vmatpush.msk.msra.mxu0 %vm614_vm2, %v1537_v50 }
 0x1f3   : > { %1550 = vmatpush.msk.msrb.mxu0 %vm614_vm2, %v1549_v56 }
 0x26d   : > { %v802_v52 = vpop.f32.mrf.mxu0 }
 0x26e   : > { %982 = vrot.lane.b32.xlu0 %v802_v52, %s1996_s16  ;;  %892 = vrot.lane.b32.xlu2 %v802_v52, %s1997_s6  ;;  %v809_v53 = vrot.slane %v802_v52, 1  ;;  %v863_v54 = vrot.slane %v802_v52, 2 }
 0x26f   : > { %1536 = vmatmul.msk.f32.vlgmr.msrb.gmra.mxu2 %vm810_vm6, %v802_v52 }
 0x270   : > { %922 = vrot.lane.b32.xlu1 %v809_v53, %s1997_s6  ;;  %1534 = vmatmul.msk.f32.vlgmr.msrb.gmra.mxu1 %vm810_vm6, %v809_v53 }
 0x271   : > { %1539 = vmatmul.msk.f32.vlgmr.msra.gmra.mxu0 %vm810_vm6, %v863_v54  ;;  %1553 = vmatpush.msk.msrb.mxu1 %vm614_vm2, %v1552_v55  ;;  %v1236_v55 = vld [vmem:[#allocation11] sm:$0x1] }
 0x272   : > { %1562 = vmatpush.msk.msra.mxu0 %vm614_vm2, %v1561_v59  ;;  %1556 = vmatpush.msk.msrb.mxu2 %vm614_vm2, %v1555_v61  ;;  %v1322_v61 = vld [vmem:[#allocation13 + $0x8] sm:$0xff] }
 0x276   : > { %1042 = vrot.lane.b32.xlu2 %v863_v54, %s1996_s16  ;;  %1102 = vrot.lane.b32.xlu0 %v809_v53, %s1998_s29 }
 0x278   : > { %952 = vrot.lane.b32.xlu1 %v863_v54, %s1997_s6 }
 0x27e   : > { %1012 = vrot.lane.b32.xlu2 %v809_v53, %s1996_s16  ;;  %v1292_v53 = vld [vmem:[%s2435_s11 + $0x8] sm:$0xff] }
 0x280   : > { %1072 = vrot.lane.b32.xlu1 %v802_v52, %s1998_s29  ;;  %v1293_v52 = vld [vmem:[%s2435_s11 + $0x10] sm:$0xff] }
 0x288   : > { %1132 = vrot.lane.b32.xlu1 %v863_v54, %s1998_s29  ;;  %v1291_v54 = vld [vmem:[%s2435_s11] sm:$0xff] }
 0x2c8   : > { %v893_v60 = vpop.permute.xlu2 %892 }
 0x2c9   : > { %1542 = vmatmul.msk.f32.vlgmr.msra.gmra.mxu1 %vm810_vm6, %v893_v60 }
 0x2ca   : > { %1565 = vmatpush.msk.msra.mxu1 %vm614_vm2, %v1564_v1 }
 0x2d0   : > { %v1043_v62 = vpop.permute.xlu2 %1042 }
 0x2d8   : > { %v1013_v0 = vpop.permute.xlu2 %1012 }
 0x2d9   : > { %1554 = vmatmul.msk.f32.vlgmr.msrb.gmra.mxu1 %vm810_vm6, %v1013_v0 }
 0x2da   : > { %1283 = vmatpush.msrb.mxu1 %v1265_v47 }
 0x2dc   : > { %1284 = vmatpush.msrb.mxu1 %v1264_v48 }
 0x2e0   : > { %v983_v2 = vpop.permute.xlu0 %982 }
 0x2e1   : > { %1551 = vmatmul.msk.f32.vlgmr.msrb.gmra.mxu0 %vm810_vm6, %v983_v2 }
 0x2e2   : > { %v923_v3 = vpop.permute.xlu1 %922  ;;  %1256 = vmatpush.msrb.mxu0 %v1238_v43 }
 0x2e3   : > { %1545 = vmatmul.msk.f32.vlgmr.msra.gmra.mxu2 %vm810_vm6, %v923_v3 }
 0x2e4   : > { %1567 = vmatpush.msk.msra.mxu2 %vm614_vm2, %v1180_v9  ;;  %1257 = vmatpush.msrb.mxu0 %v1237_v46 }
 0x2e6   : > { %1200 = vmatpush.msra.mxu2 %v1179_v10 }
 0x2e8   : > { %v1103_v4 = vpop.permute.xlu0 %1102  ;;  %1201 = vmatpush.msra.mxu2 %v1178_v36 }
 0x2e9   : > { %1563 = vmatmul.msk.f32.vlgmr.msra.gmra.mxu0 %vm810_vm6, %v1103_v4 }
 0x2ea   : > { %v953_v5 = vpop.permute.xlu1 %952  ;;  %1202 = vmatpush.msra.mxu2 %v1177_v37 }
 0x2eb   : > { %1548 = vmatmul.msk.f32.vlgmr.msrb.gmra.mxu3 %vm810_vm6, %v953_v5  ;;  %1557 = vmatmul.msk.f32.vlgmr.msrb.gmra.mxu2 %vm810_vm6, %v1043_v62  ;;  %v1321_v62 = vld [vmem:[#allocation13] sm:$0xff] }
 0x2ec   : > { %1203 = vmatpush.msra.mxu2 %v1176_v38 }
 0x2ed   : > { %v833_v8 = vpop.f32.mrf.mxu1 }
 0x2ee   : > { %v886_v13 = vpop.f32.mrf.mxu0  ;;  %1312 = vmatpush.msrb.mxu2 %v1294_v51 }
 0x2f0   : > { %1313 = vmatpush.msrb.mxu2 %v1293_v52 }
 0x2f2   : > { %v1073_v6 = vpop.permute.xlu1 %1072  ;;  %v858_v11 = vpop.f32.mrf.mxu2  ;;  %1314 = vmatpush.msrb.mxu2 %v1292_v53 }
 0x2f3   : > { %1560 = vmatmul.msk.f32.vlgmr.msra.gmra.mxu3 %vm810_vm6, %v1073_v6  ;;  %v859_v12 = vadd.f32 %v858_v11, %v833_v8 }
 0x2f4   : > { %1315 = vmatpush.msrb.mxu2 %v1291_v54 }
 0x2f5   : > { %v889_v15 = vadd.f32 %v886_v13, %v859_v12 }
 0x2fa   : > { %v1133_v7 = vpop.permute.xlu1 %1132 }
 0x2fb   : > { %1566 = vmatmul.msk.f32.vlgmr.msra.gmra.mxu1 %vm810_vm6, %v1133_v7 }
 0x346   : > { %v916_v14 = vpop.f32.mrf.mxu1 }
 0x347   : > { %v919_v17 = vadd.f32 %v916_v14, %v889_v15 }
 0x356   : > { %v1036_v23 = vpop.f32.mrf.mxu1 }
 0x35e   : > { %v1006_v19 = vpop.f32.mrf.mxu0 }
 0x366   : > { %v946_v16 = vpop.f32.mrf.mxu2  ;;  %v1126_v29 = vpop.f32.mrf.mxu0 }
 0x367   : > { %v949_v18 = vadd.f32 %v946_v16, %v919_v17 }
 0x36e   : > { %v976_v20 = vpop.f32.mrf.mxu3  ;;  %v1066_v25 = vpop.f32.mrf.mxu2 }
 0x36f   : > { %v979_v21 = vadd.f32 %v976_v20, %v949_v18 }
 0x371   : > { %v1009_v22 = vadd.f32 %v1006_v19, %v979_v21 }
 0x373   : > { %v1039_v24 = vadd.f32 %v1036_v23, %v1009_v22 }
 0x375   : > { %v1069_v26 = vadd.f32 %v1066_v25, %v1039_v24 }
 0x376   : > { %v1096_v27 = vpop.f32.mrf.mxu3 }
 0x377   : > { %v1099_v28 = vadd.f32 %v1096_v27, %v1069_v26 }
 0x378   : > { %v1156_v32 = vpop.f32.mrf.mxu1 }
 0x379   : > { %v1129_v30 = vadd.f32 %v1126_v29, %v1099_v28 }
 0x37b   : > { %v1159_v33 = vadd.f32 %v1156_v32, %v1129_v30 }
 0x37d   : > { %v1164_v34 = vadd.f32 %v1692_v31, %v1159_v33 }
 0x37f   : > { %v1165_v35 = vmax.f32 %v1164_v34, 0.0 }
 0x381   : > { %1167 = vrot.lane.b32.xlu2 %v1165_v35, %s1995_s13  ;;  %s2469_s13 = sld [smem:[#allocation28_spill]] }
 0x387   : > { %v1323_v3 = vld [vmem:[%s2469_s13] sm:$0x1] }
 0x3db   : > { %v1168_v39 = vpop.permute.xlu2 %1167 }
 0x3dc   : > { %v1170_v40 = vmax.f32 %v1165_v35, %v1168_v39 }
 0x3de   : > { %v1172_v41 = vrot.slane %v1170_v40, 1 }
 0x3e0   : > { %v1174_v42 = vmax.f32 %v1170_v40, %v1172_v41 }
 0x3e2   : > { %1568 = vmatmul.msk.f32.vlgmr.msra.gmra.mxu2 %vm1181_vm7, %v1174_v42 }
 0x465   : > { %v1205_v45 = vpop.f32.mrf.mxu2 }
 0x466   : > { %1569 = vmatpush.msk.msrb.mxu3 %vm1212_vm8, %v1205_v45 }
 0x467   : > { %1570 = vmatmul.msk.f32.vlgmr.msrb.gmra.mxu3 %vm1208_vm9, %v1175_v44 }
 0x468   : > { %1341 = vmatpush.msra.mxu3 %v1322_v61 }
 0x46a   : > { %1342 = vmatpush.msra.mxu3 %v1321_v62 }
 0x4ea   : > { %v1233_v49 = vpop.f32.mrf.mxu3 }
 0x4eb   : > { %v1266_v50 = vrot.slane %v1233_v49, 1  ;;  %1571 = vmatmul.msk.f32.vlgmr.msrb.gmra.mxu0 %vm618_vm0, %v1233_v49 }
 0x4ed   : > { %1572 = vmatmul.msk.f32.vlgmr.msrb.gmra.mxu1 %vm618_vm0, %v1266_v50 }
 0x568   : > { %v1259_v56 = vpop.f32.mrf.mxu0 }
 0x569   : > { %v1262_v57 = vadd.f32 %v1259_v56, %v1236_v55 }
 0x56a   : > { %v1286_v58 = vpop.f32.mrf.mxu1 }
 0x56b   : > { %v1289_v59 = vadd.f32 %v1286_v58, %v1262_v57 }
 0x56d   : > { %v1290_v60 = vmax.f32 %v1289_v59, 0.0 }
 0x56f   : > { %1573 = vmatmul.msk.f32.vlgmr.msrb.gmra.mxu2 %vm1296_vm10, %v1290_v60 }
 0x5f2   : > { %v1317_v0 = vpop.f32.mrf.mxu2 }
 0x5f3   : > { %v1318_v1 = vadd.f32 %v1317_v0, %v1295_v63 }
 0x5f5   : > { %v1320_v2 = vmax.f32 %v1318_v1, 0.0 }
 0x5f7   : > { %1574 = vmatmul.msk.f32.vlgmr.msra.gmra.mxu3 %vm618_vm0, %v1320_v2 }
 0x67a   : > { %v1344_v4 = vpop.f32.mrf.mxu3 }
 0x67b   : > { %v1345_v5 = vadd.f32 %v1344_v4, %v1323_v3 }
 0x67d   : > { %v1348_v6 = vsel %vm1347_vm11, %v1345_v5, -inf }
 0x67e   : > { %1349 = vmax.xlane.f32.xlu0 %v1348_v6 }
 0x6f1   : > { %v1350_v7 = vpop.xlane.xlu0 %1349 }
 0x6f2   : > { %v1351_v8 = vsub.f32 %v1345_v5, %v1350_v7 }
 0x6f4   : > { %v1352_v9 = vmul.f32 1.442695, %v1351_v8 }
 0x6f6   : > { %1693 = vpow2.f32 %v1352_v9 }
 0x6fc   : > { %v1694_v10 = vpop.eup %1693 }
 0x6fd   : > { %v1354_v11 = vsel %vm1347_vm11, %v1694_v10, 0.0 }
 0x6fe   : > { %1355 = vadd.xlane.f32.xlu1 %v1354_v11 }
 0x771   : > { %v1356_v12 = vpop.xlane.xlu1 %1355 }
 0x772   : > { %1695 = vlog2.f32 %v1356_v12 }
 0x778   : > { %v1696_v13 = vpop.eup %1695 }
 0x779   : > { %v1358_v14 = vmul.f32 0.6931472, %v1696_v13 }
 0x77b   : > { %v1359_v15 = vsub.f32 %v1351_v8, %v1358_v14 }
 0x77d   : > { %1360 = vst.msk [vmem:[%s604_s2] sm:$0x1] %vm1347_vm11, %v1359_v15 }
 0x77e   : > { %1934 = shalt.err (!%p1931_p9)
}
 0x77f   : > { %1604 = dma.vmem_to_hbm [thread:$0]  (%p2182_p5), %s1373_s24, 16, %s1375_s10, %s1362_s3  }
 0x780 PF: > { %s1386_s27 = sand.u32 1, %s1973_s18   ;;  %p2471_p10 = scmp.ge.s32.totalorder %s1985_s21, 2 }
 0x781   : > { %s1387_s13 = scalar_lea.sflag [#allocation4], %s1386_s27 }
 0x782   : > { %p1630_p13 = pnand %p2471_p10, %p2186_p6 }
 0x784   : > { %p1631_p11 = pneg %p1630_p13 }
 0x786   : > { %1968 = dma.done.wait (%p1631_p11), %s1387_s13, 16  }
 0x787   : > { %1970 = vsyncadd (%p1631_p11), %s1387_s13, 4294967280  ;;  %s2472_s6 = sld [smem:[#allocation20_spill]]  ;;  %p31_p0 = scmp.ge.s32.totalorder %s2156_s22, 4  }
 0x788   : > { %s2473_s18 = smov %s1977_s19  ;;  %s2474_s19 = smov %s1981_s20 }
 0x789   : > { %s2476_s21 = smov %s2156_s22  ;;  %33 = sbr.rel (!%p31_p0) target bundleno = 18 (0x12), region = 163 }
 0x78d   : > { %s2475_s20 = smov %s2472_s6 }
 0x78e   :  { %1392 = vsyncpa [#allocation3], 1 }
 0x78f   :  { %1394 = vsyncpa [#allocation3 + $0x1], 1 }
 0x790   :  { %1395 = vsyncpa [#allocation6], 1 }
 0x791   :  { %1396 = vsyncpa [#allocation9], 1 }
 0x792   :  { %1397 = vsyncpa [#allocation12], 1 }
 0x793   :  { %1398 = vsyncpa [#allocation4], 1 }
 0x794   :  { %1400 = vsyncpa [#allocation4 + $0x1], 1 }

</bundles_post_ra>
